<compile_context>
chip_gen: v7x
topology: tpu7x:2x2x1
jax: 0.10.0
libtpu: 0.0.40
codegen_flags: <defaults>
</compile_context>

<pallas_src>
import jax
import jax.numpy as jnp
from jax.experimental import pallas as pl
from jax.experimental.pallas import tpu as pltpu

RMS_EPS = 1e-6  # RMSNorm(affine=False) epsilon


def _round_up(v: int, m: int) -> int:
    return (v + m - 1) // m * m


def _cdiv(a: int, b: int) -> int:
    return (a + b - 1) // b


def _physical_vmem_bytes() -> int:
    """Per-TensorCore VMEM capacity; conservative fallback if unqueryable."""
    try:
        info = pltpu.get_tpu_info()
        cap = int(getattr(info, "vmem_capacity_bytes", 0) or 0)
        if cap > 0:
            return cap
    except Exception:
        pass
    return 64 * 1024 * 1024  # v7x per-TC VMEM (smallest current generation)


def _make_fsq_kernel(latent_bins: int, dim_in: int, matmul_dtype):
    inv_dim = 1.0 / float(dim_in)
    half_bins = (latent_bins - 1) / 2.0

    def kernel(x_ref, w_ref, idx_ref):
        # RMSNorm (no affine) along the feature axis, in float32.
        x = x_ref[...].astype(jnp.float32)
        ms = jnp.sum(x * x, axis=-1, keepdims=True) * inv_dim
        xn = x * jax.lax.rsqrt(ms + RMS_EPS)

        # FusedLinear (no bias) on the MXU, f32 accumulation.  matmul_dtype is
        # bf16 for bf16 activations (torch-like), f32 otherwise (exact parity
        # with the f32 reference).
        h = jnp.dot(xn.astype(matmul_dtype), w_ref[...],
                    preferred_element_type=jnp.float32)

        # FSQ quantization -> integer bin indices.  The straight-through
        # forward value (idx * 2/(bins-1) - 1) is reconstructed in the wrapper.
        z = jnp.tanh(h)
        idxs = jnp.round((z + 1.0) * half_bins)   # half-to-even, like torch.round
        idx_ref[...] = idxs.astype(idx_ref.dtype)

    return kernel


def fsq_forward(x, weight, latent_bins, *, tile_n=None, matmul_dtype=None):
    """x: [..., dim_in], weight: [dim_in, latent_ndim].

    Returns (z, idxs): z has x.dtype, idxs is int32
    (torch.long -> int32; TPU Pallas has no native i64).
    """
    *lead, dim_in = x.shape
    assert weight.shape[0] == dim_in
    latent_ndim = weight.shape[1]
    n = 1
    for d in lead:
        n *= d

    if matmul_dtype is None:
        matmul_dtype = jnp.bfloat16 if x.dtype == jnp.bfloat16 else jnp.float32
    matmul_dtype = jnp.dtype(matmul_dtype)

    # --- VMEM budgeting (generation aware). Footprints use the lane-padded
    # --- sizes the VMEM buffers will actually occupy.
    d_vmem = _round_up(dim_in, 128)
    l_vmem = _round_up(latent_ndim, 128)
    x_item = jnp.dtype(x.dtype).itemsize
    w_item = matmul_dtype.itemsize

    def working_set(t):
        return (2 * t * d_vmem * x_item          # x blocks (double-buffered)
                + 2 * t * l_vmem * 4             # idx blocks (double-buffered, i32)
                + 2 * d_vmem * l_vmem * w_item)  # weight (constant block, 2 buffers)

    phys = _physical_vmem_bytes()
    vmem_limit = (phys * 3) // 4   # headroom for Mosaic internal scratch
    budget = (vmem_limit * 3) // 4

    gran = 32  # row granularity: keeps second-minor block dims aligned for f32/bf16
    if tile_n is None:
        tile_n = 1024
        while tile_n > gran and working_set(tile_n) > budget:
            tile_n //= 2
    tile_n = max(gran, _round_up(int(tile_n), gran))

    if n <= tile_n:
        # Single block covering all rows (block == full array dims -> no
        # alignment constraint, no padding).
        tile_n = max(n, 1)
    else:
        # Nudge the step count to an even number so the "parallel" axis splits
        # evenly across v7x's two TensorCores.
        steps = _cdiv(n, tile_n)
        if steps % 2 == 1:
            tile_n = max(gran, _round_up(_cdiv(n, steps + 1), gran))

    steps = _cdiv(n, tile_n)

    # Guard: if even the minimum tile (or the weight alone) exceeds the limit,
    # raise the limit toward physical VMEM.  (For truly huge dim_in the right
    # fix is a reduction grid axis over dim_in; not needed for FSQ shapes.)
    need = working_set(tile_n)
    if need > vmem_limit:
        vmem_limit = min(phys - (4 << 20), need + (2 << 20))

    x2 = x.reshape(n, dim_in)
    w = weight.astype(matmul_dtype)

    idx2 = pl.pallas_call(
        _make_fsq_kernel(int(latent_bins), dim_in, matmul_dtype),
        out_shape=jax.ShapeDtypeStruct((n, latent_ndim), jnp.int32),
        grid=(steps,),
        in_specs=[
            pl.BlockSpec((tile_n, dim_in), lambda i: (i, 0)),
            pl.BlockSpec((dim_in, latent_ndim), lambda i: (0, 0)),
        ],
        out_specs=pl.BlockSpec((tile_n, latent_ndim), lambda i: (i, 0)),
        compiler_params=pltpu.CompilerParams(
            dimension_semantics=("parallel",),
            vmem_limit_bytes=int(vmem_limit),
        ),
    )(x2, w)

    # Dequantize outside the kernel (touches only n*latent_ndim int32 values).
    z = (idx2.astype(jnp.float32) * (2.0 / (latent_bins - 1)) - 1.0).astype(x.dtype)
    z = z.reshape(*lead, latent_ndim)
    idxs = idx2.reshape(*lead, latent_ndim)  # torch.long -> int32
    return z, idxs


def fsq_reference(x, weight, latent_bins, *, matmul_dtype=None):
    """Plain-JAX reference mirroring the PyTorch forward."""
    if matmul_dtype is None:
        matmul_dtype = jnp.bfloat16 if x.dtype == jnp.bfloat16 else jnp.float32
    dim_in = x.shape[-1]
    xf = x.astype(jnp.float32)
    ms = jnp.sum(xf * xf, axis=-1, keepdims=True) * (1.0 / dim_in)
    xn = xf * jax.lax.rsqrt(ms + RMS_EPS)
    h = jnp.dot(xn.astype(matmul_dtype), weight.astype(matmul_dtype),
                preferred_element_type=jnp.float32)
    z = jnp.tanh(h)
    idxs = jnp.round((z + 1.0) * ((latent_bins - 1) / 2.0))
    zq = idxs * (2.0 / (latent_bins - 1)) - 1.0
    return zq.astype(x.dtype), idxs.astype(jnp.int32)


def _check(name, z, idxs, z_ref, idx_ref, x_dtype, latent_bins):
    assert idxs.dtype == jnp.int32, name
    assert z.dtype == x_dtype, name
    assert z.shape == z_ref.shape and idxs.shape == idx_ref.shape, name
    diff = jnp.abs(idxs - idx_ref)
    # Allow rare off-by-one flips exactly on rounding boundaries (accumulation
    # order differs between the tiled MXU matmul and XLA's dot).
    assert int(jnp.max(diff)) <= 1, name
    assert int(jnp.sum(diff != 0)) <= max(1, diff.size // 500), name
    zerr = jnp.where(diff == 0,
                     jnp.abs(z.astype(jnp.float32) - z_ref.astype(jnp.float32)),
                     0.0)
    assert float(jnp.max(zerr)) <= 1e-5, name


if __name__ == "__main__":
    key = jax.random.PRNGKey(0)
    k1, k2, k3, k4, k5, k6 = jax.random.split(key, 6)

    # --- Small shapes consistent with the module: batch=2, seq=8, dim_in=32 ---
    batch, seq, dim_in = 2, 8, 32
    latent_ndim, latent_bins = 8, 8
    x = jax.random.normal(k1, (batch, seq, dim_in), dtype=jnp.float32)
    weight = jax.random.normal(k2, (dim_in, latent_ndim), dtype=jnp.float32) / jnp.sqrt(dim_in)

    z, idxs = fsq_forward(x, weight, latent_bins)
    jax.block_until_ready((z, idxs))
    z_ref, idx_ref = fsq_reference(x, weight, latent_bins)
    assert z.shape == (batch, seq, latent_ndim)
    assert idxs.shape == (batch, seq, latent_ndim)
    _check("small_f32", z, idxs, z_ref, idx_ref, x.dtype, latent_bins)

    # --- Ragged / non-128-aligned shapes: no padding copies, partial last block ---
    b2, s2, d2, l2, bins2 = 4, 300, 160, 6, 16
    x_b = jax.random.normal(k3, (b2, s2, d2), dtype=jnp.float32)
    w_b = jax.random.normal(k4, (d2, l2), dtype=jnp.float32) / jnp.sqrt(d2)
    z_b, idx_b = fsq_forward(x_b, w_b, bins2)
    jax.block_until_ready((z_b, idx_b))
    z_br, idx_br = fsq_reference(x_b, w_b, bins2)
    _check("ragged_f32", z_b, idx_b, z_br, idx_br, x_b.dtype, bins2)

    # --- bf16 activations: matmul runs in bf16 with f32 accumulation ---
    b3, s3, d3, l3, bins3 = 4, 64, 256, 8, 8
    x_c = jax.random.normal(k5, (b3, s3, d3), dtype=jnp.float32).astype(jnp.bfloat16)
    w_c = jax.random.normal(k6, (d3, l3), dtype=jnp.float32) / jnp.sqrt(d3)
    z_c, idx_c = fsq_forward(x_c, w_c, bins3)
    jax.block_until_ready((z_c, idx_c))
    z_cr, idx_cr = fsq_reference(x_c, w_c, bins3)
    _check("bf16", z_c, idx_c, z_cr, idx_cr, x_c.dtype, bins3)

    # TODO(synk): straight-through gradient (z + (idxs - z).detach()) is a
    # training-time autodiff construct; only the forward pass is implemented.
    print("KERNEL_OK")
</pallas_src>

<mosaic_0001>
module attributes {stable_mosaic.version = 11 : i64} {
  func.func @kernel(%arg0: i32, %arg1: memref<16x32xf32, #tpu.memory_space<vmem>>, %arg2: memref<32x8xf32, #tpu.memory_space<vmem>>, %arg3: memref<16x8xi32, #tpu.memory_space<vmem>>) attributes {dimension_semantics = [#tpu.dimension_semantics<parallel>], iteration_bounds = array<i64: 1>, scalar_prefetch = 0 : i64, scratch_operands = 0 : i64, tpu.core_type = #tpu.core_type<tc>, window_params = [{transform_indices = @transform_0, window_bounds = array<i64: 16, 32>}, {pipeline_mode = #tpu.pipeline_mode<synchronous>, transform_indices = @transform_1, window_bounds = array<i64: 32, 8>}, {transform_indices = @transform_2, window_bounds = array<i64: 16, 8>}]} {
    %c0 = arith.constant 0 : index
    %c0_0 = arith.constant 0 : index
    %0 = vector.load %arg1[%c0, %c0_0] : memref<16x32xf32, #tpu.memory_space<vmem>>, vector<16x32xf32>
    %1 = arith.mulf %0, %0 : vector<16x32xf32>
    %cst = arith.constant dense<0.000000e+00> : vector<16xf32>
    %2 = vector.multi_reduction <add>, %1, %cst [1] : vector<16x32xf32> to vector<16xf32>
    %3 = vector.shape_cast %2 : vector<16xf32> to vector<16x1xf32>
    %cst_1 = arith.constant 3.125000e-02 : f32
    %4 = vector.broadcast %cst_1 : f32 to vector<16x1xf32>
    %5 = arith.mulf %3, %4 : vector<16x1xf32>
    %cst_2 = arith.constant 9.99999997E-7 : f32
    %6 = vector.broadcast %cst_2 : f32 to vector<16x1xf32>
    %7 = arith.addf %5, %6 : vector<16x1xf32>
    %8 = math.rsqrt %7 : vector<16x1xf32>
    %9 = vector.broadcast %8 : vector<16x1xf32> to vector<16x32xf32>
    %10 = arith.mulf %0, %9 : vector<16x32xf32>
    %c0_3 = arith.constant 0 : index
    %c0_4 = arith.constant 0 : index
    %11 = vector.load %arg2[%c0_3, %c0_4] : memref<32x8xf32, #tpu.memory_space<vmem>>, vector<32x8xf32>
    %cst_5 = arith.constant dense<0.000000e+00> : vector<16x8xf32>
    %12 = tpu.matmul %10, %11, %cst_5 {dimension_numbers = #tpu.dot_dimension_numbers<[1], [0], [0], [1], [0, 0, 1, 1], [], []>} : vector<16x32xf32>, vector<32x8xf32>, vector<16x8xf32> -> vector<16x8xf32>
    %13 = math.tanh %12 : vector<16x8xf32>
    %cst_6 = arith.constant 1.000000e+00 : f32
    %14 = vector.broadcast %cst_6 : f32 to vector<16x8xf32>
    %15 = arith.addf %13, %14 : vector<16x8xf32>
    %cst_7 = arith.constant 3.500000e+00 : f32
    %16 = vector.broadcast %cst_7 : f32 to vector<16x8xf32>
    %17 = arith.mulf %15, %16 : vector<16x8xf32>
    %18 = math.roundeven %17 : vector<16x8xf32>
    %19 = arith.fptosi %18 : vector<16x8xf32> to vector<16x8xi32>
    %c0_8 = arith.constant 0 : index
    %c0_9 = arith.constant 0 : index
    %20 = vector.load %arg3[%c0_8, %c0_9] : memref<16x8xi32, #tpu.memory_space<vmem>>, vector<16x8xi32>
    tpu.vector_store %arg3[%c0_8, %c0_9], %19 {strides = array<i32>} : memref<16x8xi32, #tpu.memory_space<vmem>>, vector<16x8xi32>,
    return
  }
  func.func @transform_0(%arg0: i32) -> (i32, i32) {
    %c0_i32 = arith.constant 0 : i32
    %c0_i32_0 = arith.constant 0 : i32
    return %arg0, %c0_i32 : i32, i32
  }
  func.func @transform_1(%arg0: i32) -> (i32, i32) {
    %c0_i32 = arith.constant 0 : i32
    %c0_i32_0 = arith.constant 0 : i32
    %c0_i32_1 = arith.constant 0 : i32
    return %c0_i32, %c0_i32_0 : i32, i32
  }
  func.func @transform_2(%arg0: i32) -> (i32, i32) {
    %c0_i32 = arith.constant 0 : i32
    %c0_i32_0 = arith.constant 0 : i32
    return %arg0, %c0_i32 : i32, i32
  }
}

</mosaic_0001>

<bundles_post_ra>
// kernel: tpu_custom_call.1
= control target key start
LH: loop header
LB: loop body
LE: loop exit
PB: predicated region body
PF: predicated region fallthrough
CT: control target
= control target key end

     0   :  { %vm15_vm0 = vcmask 261120   ;;  %vm123_vm1 = vcmask 64512   ;;  %s214_s0 = inlined_call_operand.vmem [shape: f32[16,32], index: 0, kind: input, shape index: {}]   ;;  %s215_s1 = inlined_call_operand.vmem [shape: f32[32,8], index: 1, kind: input, shape index: {}]   ;;  %s216_s2 = inlined_call_operand.vmem [shape: s32[16,8], index: 2, kind: output, shape index: {}]  }
   0x1   :  { %v11_v0 = vld [vmem:[%s214_s0] sm:$0xff]  ;;  %v12_v1 = vld [vmem:[%s214_s0 + $0x8] sm:$0xff]  ;;  %v32_v8 = vld [vmem:[%s215_s1 + $0x10] sm:$0xff] }
   0x2   :  { %v13_v2 = vmul.f32 %v11_v0, %v11_v0  ;;  %v14_v3 = vmul.f32 %v12_v1, %v12_v1  ;;  %v30_v6 = vld [vmem:[%s215_s1] sm:$0xff]  ;;  %v31_v7 = vld [vmem:[%s215_s1 + $0x8] sm:$0xff]  ;;  %v33_v10 = vld [vmem:[%s215_s1 + $0x18] sm:$0xff] }
   0x3   :  { %v149_v9 = vpack.c.bf16 %v31_v7, %v30_v6  ;;  %v153_v11 = vpack.c.bf16 %v33_v10, %v32_v8 }
   0x4   :  { %v16_v4 = vsel %vm15_vm0, %v13_v2, 0.0  ;;  %v19_v5 = vsel %vm15_vm0, %v14_v3, 0.0 }
   0x5   :  { %17 = vadd.xlane.f32.xlu0 %v16_v4  ;;  %150 = vmatprep.subr.bf16.mxu0 %v149_v9 }
   0x6   :  { %152 = vmatpush3.bf16.msra.mxu0 %v149_v9 }
   0x7   :  { %154 = vmatprep.subr.bf16.mxu0 %v153_v11 }
   0x9   :  { %20 = vadd.xlane.f32.xlu0 %v19_v5 }
   0xa   :  { %156 = vmatpush3.bf16.msra.mxu0 %v153_v11 }
  0x92   :  { %v18_v12 = vpop.xlane.xlu0 %17 }
  0x93   :  { %v22_v13 = vmul.f32 0.03125, %v18_v12 }
  0x95   :  { %v24_v14 = vadd.f32 1e-06, %v22_v13 }
  0x96   :  { %v21_v15 = vpop.xlane.xlu0 %20 }
  0x97   :  { %163 = vrsqrt.f32 %v24_v14  ;;  %v23_v16 = vmul.f32 0.03125, %v21_v15 }
  0x99   :  { %v25_v17 = vadd.f32 1e-06, %v23_v16 }
  0x9b   :  { %165 = vrsqrt.f32 %v25_v17 }
  0xa1   :  { %v164_v18 = vpop.eup %163 }
  0xa2   :  { %v28_v19 = vmul.f32 %v164_v18, %v11_v0 }
  0xa4   :  { %146 = vmatprep.mubr.msk.f32.mxu0 %vm15_vm0, %v28_v19 }
  0xa5   :  { %v166_v20 = vpop.eup %165 }
  0xa6   :  { %v29_v21 = vmul.f32 %v166_v20, %v12_v1 }
  0xa8   :  { %147 = vmatmul.mubr.msk.f32.vlgmr.msra.gmra.mrb[0].mxu0 %vm15_vm0, %v29_v21 }
 0x17b   :  { %v148_v22 = vpop.f32.mrb[0].mxu0 }
 0x17c   :  { %167 = vtanh.f32 %v148_v22  ;;  %v106_v23 = vpop.f32.mrb[1].mxu0 }
 0x17d   :  { %169 = vtanh.f32 %v106_v23 }
 0x186   :  { %v168_v24 = vpop.eup %167 }
 0x187   :  { %v170_v25 = vpop.eup %169  ;;  %v118_v26 = vadd.f32 1.0, %v168_v24 }
 0x188   :  { %v117_v27 = vadd.f32 1.0, %v170_v25 }
 0x189   :  { %v120_v28 = vmul.f32 3.5, %v118_v26 }
 0x18a   :  { %v119_v29 = vmul.f32 3.5, %v117_v27 }
 0x18b   :  { %v162_v30 = vcvt.f32.s32 %v120_v28 }
 0x18c   :  { %v159_v31 = vcvt.f32.s32 %v119_v29 }
 0x18d   :  { %125 = vst.msk [vmem:[%s216_s2 + $0x8] sm:$0xff] %vm123_vm1, %v162_v30 }
 0x18e   :  { %124 = vst.msk [vmem:[%s216_s2] sm:$0xff] %vm123_vm1, %v159_v31 }

</bundles_post_ra>
